<compile_context>
chip_gen: v6e
topology: v6e:2x2x1
jax: 0.10.0
libtpu: 0.0.40
codegen_flags: <defaults>
</compile_context>

<pallas_src>
import functools

import jax
import jax.numpy as jnp
from jax.experimental import pallas as pl
from jax.experimental.pallas import tpu as pltpu


def _round_up(x: int, m: int) -> int:
    return ((x + m - 1) // m) * m


def _pick_tile(dim_pad: int, gran: int, t_max: int) -> int:
    """Largest tile (multiple of `gran`) that exactly divides `dim_pad` and is
    <= t_max.  If the whole padded dim fits in a single tile (or is within 1.25x
    of t_max) use it whole: no quantization waste, no extra grid steps."""
    if dim_pad <= max(t_max, gran) or dim_pad <= int(1.25 * t_max):
        return dim_pad
    units = dim_pad // gran
    d_max = max(1, t_max // gran)
    best = 1
    for d in range(1, min(units, d_max) + 1):
        if units % d == 0:
            best = d
    return best * gran


def _linear_kernel_nosplit(x_ref, w_ref, b_ref, o_ref):
    """Single K step: dot + bias straight to the output tile (no scratch / when)."""
    o_ref[...] = (
        jnp.dot(x_ref[...], w_ref[...], preferred_element_type=jnp.float32)
        + b_ref[...]
    ).astype(o_ref.dtype)


def _linear_kernel_ksplit(x_ref, w_ref, b_ref, o_ref):
    """K-reduction: accumulate directly into the resident f32 output block."""
    k = pl.program_id(2)

    @pl.when(k == 0)
    def _():
        o_ref[...] = jnp.zeros_like(o_ref)

    o_ref[...] += jnp.dot(x_ref[...], w_ref[...], preferred_element_type=jnp.float32)

    @pl.when(k == pl.num_programs(2) - 1)
    def _():
        o_ref[...] += b_ref[...]  # bias rides the VPU once, in the epilogue only


@functools.partial(
    jax.jit, static_argnames=("classes", "tm", "tn", "tk", "matmul_dtype")
)
def _forward(x, w_p, b_p, *, classes, tm, tn, tk, matmul_dtype):
    batch, no_hidden = x.shape
    h_pad, c_pad = w_p.shape
    b_pad = _round_up(batch, 8)

    # Per-call activation prep only (weight/bias were prepared once at init).
    x_p = jnp.pad(x, ((0, b_pad - batch), (0, h_pad - no_hidden))).astype(matmul_dtype)

    nm, nn_, nk = b_pad // tm, c_pad // tn, h_pad // tk

    if nk == 1:
        grid = (nm, nn_)
        in_specs = [
            pl.BlockSpec((tm, tk), lambda i, j: (i, 0)),   # x tile
            pl.BlockSpec((tk, tn), lambda i, j: (0, j)),   # W^T tile
            pl.BlockSpec((1, tn), lambda i, j: (0, j)),    # bias tile
        ]
        out_specs = pl.BlockSpec((tm, tn), lambda i, j: (i, j))
        kernel = _linear_kernel_nosplit
        dim_sem = ("parallel", "parallel")
    else:
        # Deeper buffering on the streamed weight operand (small-batch regime is
        # pure weight streaming, so hide the DMA latency).  Fall back gracefully
        # if this jax version's BlockSpec has no pipeline_mode kwarg.
        try:
            w_spec = pl.BlockSpec(
                (tk, tn), lambda i, j, k: (k, j), pipeline_mode=pl.Buffered(3)
            )
        except (TypeError, AttributeError):
            w_spec = pl.BlockSpec((tk, tn), lambda i, j, k: (k, j))
        grid = (nm, nn_, nk)
        in_specs = [
            pl.BlockSpec((tm, tk), lambda i, j, k: (i, k)),
            w_spec,
            pl.BlockSpec((1, tn), lambda i, j, k: (0, j)),
        ]
        out_specs = pl.BlockSpec((tm, tn), lambda i, j, k: (i, j))
        kernel = _linear_kernel_ksplit
        dim_sem = ("parallel", "parallel", "arbitrary")

    out = pl.pallas_call(
        kernel,
        out_shape=jax.ShapeDtypeStruct((b_pad, c_pad), jnp.float32),
        grid_spec=pltpu.PrefetchScalarGridSpec(
            num_scalar_prefetch=0,
            grid=grid,
            in_specs=in_specs,
            out_specs=out_specs,
        ),
        compiler_params=pltpu.CompilerParams(
            dimension_semantics=dim_sem,
            vmem_limit_bytes=32 * 1024 * 1024,  # safe on v5e/v6e (128 MiB) and v7x (64 MiB)
        ),
    )(x_p, w_p, b_p)

    return out[:batch, :classes]


class OutputLayerBasicNet:
    """Pallas TPU implementation of outputLayerBasicNet (y = x @ W^T + b).

    Weight is transposed, padded and (optionally) cast ONCE at construction;
    only the activation is padded per call.
    """

    def __init__(self, weight, bias, *, matmul_dtype=jnp.float32,
                 tm_max=512, tn_max=512, tk_max=1024):
        classes, no_hidden = weight.shape
        self.classes = int(classes)
        self.no_hidden = int(no_hidden)
        self.matmul_dtype = matmul_dtype
        self.tm_max = tm_max

        h_pad = _round_up(self.no_hidden, 128)
        c_pad = _round_up(self.classes, 128)   # lane-dense (multiple-of-128) output
        self.tk = _pick_tile(h_pad, 128, tk_max)
        self.tn = _pick_tile(c_pad, 128, tn_max)

        # One-time weight prep (static): transpose -> (H, C), zero-pad, cast.
        w_t = jnp.asarray(weight, jnp.float32).T
        self.w_p = jnp.pad(
            w_t, ((0, h_pad - self.no_hidden), (0, c_pad - self.classes))
        ).astype(matmul_dtype)
        # Bias stays f32: epilogue add runs on the VPU in f32 (v5e has no bf16 VPU).
        self.b_p = jnp.pad(
            jnp.asarray(bias, jnp.float32), (0, c_pad - self.classes)
        ).reshape(1, c_pad)

    def __call__(self, x):
        batch = x.shape[0]
        b_pad = _round_up(batch, 8)
        tm = _pick_tile(b_pad, 8, self.tm_max)
        return _forward(
            x, self.w_p, self.b_p,
            classes=self.classes, tm=tm, tn=self.tn, tk=self.tk,
            matmul_dtype=self.matmul_dtype,
        )


def init_params(key, no_hidden, classes):
    # Xavier-uniform weight (matches nn.init.xavier_uniform_), zero bias.
    bound = float(jnp.sqrt(6.0 / (no_hidden + classes)))
    weight = jax.random.uniform(
        key, (classes, no_hidden), dtype=jnp.float32, minval=-bound, maxval=bound
    )
    bias = jnp.zeros((classes,), dtype=jnp.float32)
    return weight, bias


if __name__ == "__main__":
    key = jax.random.PRNGKey(0)

    # --- 1) small shapes consistent with the module (single-tile fast path) ---
    no_hidden, classes, batch = 32, 16, 8
    k_x, k_w, key = jax.random.split(key, 3)
    x = jax.random.normal(k_x, (batch, no_hidden), dtype=jnp.float32)
    weight, bias = init_params(k_w, no_hidden, classes)

    layer = OutputLayerBasicNet(weight, bias)
    out = jax.block_until_ready(layer(x))
    ref = x @ weight.T + bias
    assert out.shape == (batch, classes)
    assert jnp.allclose(out, ref, atol=1e-5, rtol=1e-5)

    # --- 2) odd shapes (padding path, nonzero bias, still single K step) ------
    no_hidden2, classes2, batch2 = 600, 130, 300
    k_x2, k_w2, key = jax.random.split(key, 3)
    x2 = jax.random.normal(k_x2, (batch2, no_hidden2), dtype=jnp.float32)
    w2, b2 = init_params(k_w2, no_hidden2, classes2)
    b2 = b2 + 0.1

    layer2 = OutputLayerBasicNet(w2, b2)
    out2 = jax.block_until_ready(layer2(x2))
    ref2 = x2 @ w2.T + b2
    assert out2.shape == (batch2, classes2)
    assert jnp.allclose(out2, ref2, atol=1e-4, rtol=1e-4)

    # --- 3) bf16-input / f32-accumulate path (looser tolerance vs f32 ref) ----
    layer2_bf16 = OutputLayerBasicNet(w2, b2, matmul_dtype=jnp.bfloat16)
    out2b = jax.block_until_ready(layer2_bf16(x2))
    assert out2b.dtype == jnp.float32
    assert jnp.allclose(out2b, ref2, atol=5e-2, rtol=5e-2)

    # --- 4) force the tiled K-split path (grid (2,2,4), buffered weight stream)
    no_hidden3, classes3, batch3 = 2048, 256, 512
    k_x3, k_w3, key = jax.random.split(key, 3)
    x3 = jax.random.normal(k_x3, (batch3, no_hidden3), dtype=jnp.float32)
    w3, b3 = init_params(k_w3, no_hidden3, classes3)
    b3 = b3 + 0.05

    layer3 = OutputLayerBasicNet(w3, b3, tm_max=256, tn_max=128, tk_max=512)
    out3 = jax.block_until_ready(layer3(x3))
    ref3 = x3 @ w3.T + b3
    assert out3.shape == (batch3, classes3)
    assert jnp.allclose(out3, ref3, atol=2e-3, rtol=2e-3)

    print("KERNEL_OK")
</pallas_src>

<mosaic_0001>
module attributes {stable_mosaic.version = 11 : i64} {
  func.func @_linear_kernel_nosplit(%arg0: i32, %arg1: i32, %arg2: memref<8x128xf32, #tpu.memory_space<vmem>>, %arg3: memref<128x128xf32, #tpu.memory_space<vmem>>, %arg4: memref<1x128xf32, #tpu.memory_space<vmem>>, %arg5: memref<8x128xf32, #tpu.memory_space<vmem>>) attributes {dimension_semantics = [#tpu.dimension_semantics<parallel>, #tpu.dimension_semantics<parallel>], iteration_bounds = array<i64: 1, 1>, scalar_prefetch = 0 : i64, scratch_operands = 0 : i64, tpu.core_type = #tpu.core_type<tc>, window_params = [{transform_indices = @transform_0, window_bounds = array<i64: 8, 128>}, {transform_indices = @transform_1, window_bounds = array<i64: 128, 128>}, {transform_indices = @transform_2, window_bounds = array<i64: 1, 128>}, {transform_indices = @transform_3, window_bounds = array<i64: 8, 128>}]} {
    %c0 = arith.constant 0 : index
    %c0_0 = arith.constant 0 : index
    %0 = vector.load %arg2[%c0, %c0_0] : memref<8x128xf32, #tpu.memory_space<vmem>>, vector<8x128xf32>
    %c0_1 = arith.constant 0 : index
    %c0_2 = arith.constant 0 : index
    %1 = vector.load %arg3[%c0_1, %c0_2] : memref<128x128xf32, #tpu.memory_space<vmem>>, vector<128x128xf32>
    %cst = arith.constant dense<0.000000e+00> : vector<8x128xf32>
    %2 = tpu.matmul %0, %1, %cst {dimension_numbers = #tpu.dot_dimension_numbers<[1], [0], [0], [1], [0, 0, 1, 1], [], []>} : vector<8x128xf32>, vector<128x128xf32>, vector<8x128xf32> -> vector<8x128xf32>
    %c0_3 = arith.constant 0 : index
    %c0_4 = arith.constant 0 : index
    %3 = vector.load %arg4[%c0_3, %c0_4] : memref<1x128xf32, #tpu.memory_space<vmem>>, vector<1x128xf32>
    %4 = vector.broadcast %3 : vector<1x128xf32> to vector<8x128xf32>
    %5 = arith.addf %2, %4 : vector<8x128xf32>
    %c0_5 = arith.constant 0 : index
    %c0_6 = arith.constant 0 : index
    %6 = vector.load %arg5[%c0_5, %c0_6] : memref<8x128xf32, #tpu.memory_space<vmem>>, vector<8x128xf32>
    tpu.vector_store %arg5[%c0_5, %c0_6], %5 {strides = array<i32>} : memref<8x128xf32, #tpu.memory_space<vmem>>, vector<8x128xf32>,
    return
  }
  func.func @transform_0(%arg0: i32, %arg1: i32) -> (i32, i32) {
    %c0_i32 = arith.constant 0 : i32
    %c0_i32_0 = arith.constant 0 : i32
    return %arg0, %c0_i32 : i32, i32
  }
  func.func @transform_1(%arg0: i32, %arg1: i32) -> (i32, i32) {
    %c0_i32 = arith.constant 0 : i32
    %c0_i32_0 = arith.constant 0 : i32
    return %c0_i32, %arg1 : i32, i32
  }
  func.func @transform_2(%arg0: i32, %arg1: i32) -> (i32, i32) {
    %c0_i32 = arith.constant 0 : i32
    %c0_i32_0 = arith.constant 0 : i32
    return %c0_i32, %arg1 : i32, i32
  }
  func.func @transform_3(%arg0: i32, %arg1: i32) -> (i32, i32) {
    %c0_i32 = arith.constant 0 : i32
    return %arg0, %arg1 : i32, i32
  }
}

</mosaic_0001>

<bundles_post_ra>
// kernel: _forward.1
= control target key start
LH: loop header
LB: loop body
LE: loop exit
PB: predicated region body
PF: predicated region fallthrough
CT: control target
= control target key end

     0   :  { %8 = vsyncpa [#allocation3], 0  ;;  %s280_s0 = inlined_call_operand.vmem [shape: f32[8,128], index: 0, kind: input, shape index: {}]   ;;  %s281_s1 = inlined_call_operand.hbm [shape: f32[128,128], index: 1, kind: input, shape index: {}]   ;;  %s282_s2 = inlined_call_operand.vmem [shape: f32[1,128], index: 2, kind: input, shape index: {}]   ;;  %s283_s3 = inlined_call_operand.hbm [shape: f32[8,128], index: 3, kind: output, shape index: {}]  }
   0x1   :  { %9 = vsyncpa [#allocation4], 0  ;;  %s242_s12 = smov [#allocation2]  }
   0x2   :  { %s17_s13 = sshll.u32 %s242_s12, 4  ;;  %s18_s13 = int_to_ptr.vmem [resolvable:$true] %s17_s13 }
   0x3   :  { %s206_s14 = scalar_lea.vmem %s18_s13, 2048  ;;  %p211_p1 = scmp.lt.s32.totalorder %s18_s13, %s18_s13 }
   0x4   :  { %p207_p0 = scmp.ne.s32.totalorder %s18_s13, %s206_s14  ;;  %p212_p2 = scmp.lt.s32.totalorder %s206_s14, %s206_s14 }
   0x6   :  { %p213_p3 = por %p212_p2, %p211_p1 }
   0x8   :  { %p214_p4 = pnand %p213_p3, %p207_p0 }
   0xa   :  { %217 = shalt.err (!%p214_p4)
}
   0xb   :  { %s243_s15 = smov 128   ;;  %s244_s16 = smov 8  }
   0xc   :  { %23 = dma.hbm_to_vmem [thread:$0]  %s281_s1, 2048, %s18_s13, [#allocation3], %s243_s15, %s243_s15, %s244_s16  }
   0xd   :  { %238 = dma.done.wait [#allocation3], 2048  }
   0xe   :  { %239 = vsyncadd [#allocation3], 4294965248  ;;  %v245_v0 = vmov 0.0   ;;  %vm246_vm0 = vmmov 0   ;;  %v45_v1 = vld [vmem:[#allocation2 + $0x78] sm:$0xff]  ;;  %v44_v2 = vld [vmem:[#allocation2 + $0x70] sm:$0xff] }
   0xf   :  { %157 = vmatprep.subr.mxu0 %v245_v0  ;;  %189 = vmatprep.mubr.msk.f32.mxu0 %vm246_vm0, %v245_v0  ;;  %v43_v3 = vld [vmem:[#allocation2 + $0x68] sm:$0xff]  ;;  %v42_v4 = vld [vmem:[#allocation2 + $0x60] sm:$0xff]  ;;  %v41_v5 = vld [vmem:[#allocation2 + $0x58] sm:$0xff]  ;;  %s247_s22 = smov [#allocation5]  }
  0x10   :  { %158 = vmatpush3.msra.mxu0 %v45_v1  ;;  %v40_v6 = vld [vmem:[#allocation2 + $0x50] sm:$0xff]  ;;  %v39_v7 = vld [vmem:[#allocation2 + $0x48] sm:$0xff]  ;;  %v38_v8 = vld [vmem:[#allocation2 + $0x40] sm:$0xff]  ;;  %s130_s23 = sshll.u32 %s247_s22, 4  ;;  %s131_s23 = int_to_ptr.vmem [resolvable:$true] %s130_s23 }
  0x11   :  { %159 = vmatprep.subr.mxu0 %v245_v0  ;;  %v37_v9 = vld [vmem:[#allocation2 + $0x38] sm:$0xff]  ;;  %v36_v10 = vld [vmem:[#allocation2 + $0x30] sm:$0xff]  ;;  %v35_v11 = vld [vmem:[#allocation2 + $0x28] sm:$0xff]  ;;  %s218_s24 = scalar_lea.vmem %s131_s23, 128  ;;  %p223_p6 = scmp.lt.s32.totalorder %s131_s23, %s131_s23 }
  0x12   :  { %160 = vmatpush3.msra.mxu0 %v44_v2  ;;  %v34_v12 = vld [vmem:[#allocation2 + $0x20] sm:$0xff]  ;;  %v33_v13 = vld [vmem:[#allocation2 + $0x18] sm:$0xff]  ;;  %v32_v14 = vld [vmem:[#allocation2 + $0x10] sm:$0xff]  ;;  %p219_p5 = scmp.ne.s32.totalorder %s131_s23, %s218_s24  ;;  %p224_p7 = scmp.lt.s32.totalorder %s218_s24, %s218_s24 }
  0x13   :  { %161 = vmatprep.subr.mxu0 %v245_v0  ;;  %v31_v15 = vld [vmem:[#allocation2 + $0x8] sm:$0xff]  ;;  %v30_v16 = vld [vmem:[#allocation2] sm:$0xff] }
  0x14   :  { %162 = vmatpush3.msra.mxu0 %v43_v3  ;;  %v29_v17 = vld [vmem:[%s280_s0] sm:$0xff]  ;;  %p225_p8 = por %p224_p7, %p223_p6 }
  0x15   :  { %163 = vmatprep.subr.mxu0 %v245_v0  ;;  %v139_v18 = vld [vmem:[%s282_s2] ss:$0 sm:$0xff] }
  0x16   :  { %164 = vmatpush3.msra.mxu0 %v42_v4  ;;  %p226_p9 = pnand %p225_p8, %p219_p5 }
  0x17   :  { %165 = vmatprep.subr.mxu0 %v245_v0 }
  0x18   :  { %166 = vmatpush3.msra.mxu0 %v41_v5 }
  0x19   :  { %167 = vmatprep.subr.mxu0 %v245_v0 }
  0x1a   :  { %168 = vmatpush3.msra.mxu0 %v40_v6 }
  0x1b   :  { %169 = vmatprep.subr.mxu0 %v245_v0 }
  0x1c   :  { %170 = vmatpush3.msra.mxu0 %v39_v7 }
  0x1d   :  { %171 = vmatprep.subr.mxu0 %v245_v0 }
  0x1e   :  { %172 = vmatpush3.msra.mxu0 %v38_v8 }
  0x1f   :  { %173 = vmatprep.subr.mxu0 %v245_v0 }
  0x20   :  { %174 = vmatpush3.msra.mxu0 %v37_v9 }
  0x21   :  { %175 = vmatprep.subr.mxu0 %v245_v0 }
  0x22   :  { %176 = vmatpush3.msra.mxu0 %v36_v10 }
  0x23   :  { %177 = vmatprep.subr.mxu0 %v245_v0 }
  0x24   :  { %178 = vmatpush3.msra.mxu0 %v35_v11 }
  0x25   :  { %179 = vmatprep.subr.mxu0 %v245_v0 }
  0x26   :  { %180 = vmatpush3.msra.mxu0 %v34_v12 }
  0x27   :  { %181 = vmatprep.subr.mxu0 %v245_v0 }
  0x28   :  { %182 = vmatpush3.msra.mxu0 %v33_v13 }
  0x29   :  { %183 = vmatprep.subr.mxu0 %v245_v0 }
  0x2a   :  { %184 = vmatpush3.msra.mxu0 %v32_v14 }
  0x2b   :  { %185 = vmatprep.subr.mxu0 %v245_v0 }
  0x2c   :  { %186 = vmatpush3.msra.mxu0 %v31_v15 }
  0x2d   :  { %187 = vmatprep.subr.mxu0 %v245_v0 }
  0x2e   :  { %188 = vmatpush3.msra.mxu0 %v30_v16 }
  0x2f   :  { %190 = vmatmul.mubr.f32.vlgmr.msra.gmra.mxu0 %v29_v17 }
  0xef   :  { %v119_v19 = vpop.f32.mrf.mxu0 }
  0xf0   :  { %v120_v20 = vadd.f32 %v139_v18, %v119_v19 }
  0xf1   :  { %v191_v21 = vpop.f32.mrf.mxu0 }
  0xf2   :  { %123 = vst [vmem:[#allocation5] sm:$0xff] %v120_v20 }
  0xf3   :  { %229 = shalt.err (!%p226_p9)
}
  0xf4   :  { %133 = dma.vmem_to_hbm [thread:$0]  %s131_s23, 128, %s283_s3, [#allocation4]  }
  0xf5   :  { %240 = dma.done.wait [#allocation4], 128  }
  0xf6   :  { %241 = vsyncadd [#allocation4], 4294967168 }
  0xf7   :  { %137 = vsyncpa [#allocation3], 1 }
  0xf8   :  { %138 = vsyncpa [#allocation4], 1 }

</bundles_post_ra>
